<compile_context>
chip_gen: v7x
topology: tpu7x:2x2x1
jax: 0.10.0
libtpu: 0.0.40
codegen_flags: <defaults>
</compile_context>

<pallas_src>
import jax
import jax.numpy as jnp
from jax.experimental import pallas as pl
from jax.experimental.pallas import tpu as pltpu


def _round_up(a, m):
    return ((a + m - 1) // m) * m


def _cdiv(a, b):
    return -(-a // b)


def _vmem_capacity_bytes():
    """Physical VMEM of the local chip; conservative 64 MiB fallback (v7x class)."""
    try:
        info = pltpu.get_tpu_info()
        cap = getattr(info, "vmem_capacity_bytes", None)
        if cap:
            return int(cap)
    except Exception:
        pass
    return 64 * 1024 * 1024


def head_kernel(x_ref, w1_ref, b1_ref, w2_ref, b2_ref, o_ref):
    # Two MXU matmuls with f32 accumulation; bias add + tanh stay in f32
    # (tanh goes to the EUP slot and overlaps with MXU/VPU work).
    x = x_ref[...].astype(w1_ref.dtype)                                # in-kernel cast (bf16)
    h = jnp.dot(x, w1_ref[...], preferred_element_type=jnp.float32)    # (tm, H) f32
    h = jnp.tanh(h + b1_ref[...])                                      # broadcast (1, H) f32
    h = h.astype(w2_ref.dtype)                                         # bf16 for 2nd GEMM
    o = jnp.dot(h, w2_ref[...], preferred_element_type=jnp.float32)    # (tm, L_pad) f32
    o_ref[...] = (o + b2_ref[...]).astype(o_ref.dtype)                 # lane-dense store


def _choose_tm(M, sublane, cap_rows, target):
    """Row tile: cover small M in 1-2 steps, else a large MXU-friendly tile."""
    cap_rows = max(sublane, (cap_rows // sublane) * sublane)
    limit = min(cap_rows, target)
    if M <= limit:
        # Whole problem fits; still emit >=2 grid steps when possible so a
        # 2-TensorCore chip (v7x) can shard the "parallel" axis across cores.
        if M >= 2 * sublane:
            return max(sublane, _round_up(_cdiv(M, 2), sublane))
        return M                      # single exact block (== full array dim)
    return max(sublane, (limit // sublane) * sublane)


def model_head(features, w_dense, b_dense, w_out, b_out, *, use_bf16=True, tm=None):
    """features: (B, S, H).  w_dense: (H, H), b_dense: (H,), w_out: (H, L), b_out: (L,)."""
    B, S, H = features.shape
    L = w_out.shape[1]
    M = B * S
    out_dtype = features.dtype

    mm_dtype = jnp.bfloat16 if use_bf16 else features.dtype
    in_bytes = jnp.dtype(features.dtype).itemsize
    mm_bytes = jnp.dtype(mm_dtype).itemsize
    out_bytes = jnp.dtype(out_dtype).itemsize
    sublane = 16 if in_bytes == 2 else 8

    # Lane-dense output: pad num_labels up to a multiple of 128 lanes.
    L_pad = _round_up(L, 128)

    # Per-generation VMEM budget (v5e/v6e: 128 MiB class, v7x: 64 MiB).
    vmem_cap = _vmem_capacity_bytes()
    vmem_budget = int(vmem_cap * 0.60)
    vmem_limit = int(vmem_cap * 0.75)
    target = 2048 if vmem_cap > (96 << 20) else 1024

    # Resident weights/biases (worst case: double-buffered), f32 biases at 4 B.
    resident = 2 * (H * H + H * L_pad) * mm_bytes + 2 * 4 * (H + L_pad)
    # Per-row VMEM: streamed x/out tiles (double-buffered) + in-kernel temporaries
    # (bf16 x cast, f32 h, bf16 h cast, f32 accumulator before the final cast).
    per_row = (2 * H * in_bytes + 2 * L_pad * out_bytes
               + 2 * H * mm_bytes + 4 * H + 4 * L_pad)
    cap_rows = max(sublane, (vmem_budget - resident) // max(per_row, 1))

    if tm is None:
        tm = _choose_tm(M, sublane, cap_rows, target)
    else:
        tm = min(max(sublane, _round_up(tm, sublane)), _round_up(M, sublane))
    num_tiles = _cdiv(M, tm)

    # Operand prep: weights cast once (tiny, resident); biases kept in f32;
    # activations are NOT padded or cast here -- streamed and cast in-kernel.
    x2d = features.reshape(M, H)
    w1 = w_dense.astype(mm_dtype)
    w2 = jnp.pad(w_out, ((0, 0), (0, L_pad - L))).astype(mm_dtype)
    b1 = b_dense.astype(jnp.float32).reshape(1, H)
    b2 = jnp.pad(b_out.astype(jnp.float32), (0, L_pad - L)).reshape(1, L_pad)

    in_specs = [
        pl.BlockSpec((tm, H), lambda i: (i, 0)),          # streamed x tile
        pl.BlockSpec((H, H), lambda i: (0, 0)),           # dense weight (resident)
        pl.BlockSpec((1, H), lambda i: (0, 0)),           # dense bias (f32)
        pl.BlockSpec((H, L_pad), lambda i: (0, 0)),       # out_proj weight (lane-padded)
        pl.BlockSpec((1, L_pad), lambda i: (0, 0)),       # out_proj bias (f32)
    ]
    out_specs = pl.BlockSpec((tm, L_pad), lambda i: (i, 0))  # lane-dense (128-mult)

    out2d = pl.pallas_call(
        head_kernel,
        out_shape=jax.ShapeDtypeStruct((M, L_pad), out_dtype),
        grid_spec=pltpu.PrefetchScalarGridSpec(
            num_scalar_prefetch=0,
            grid=(num_tiles,),
            in_specs=in_specs,
            out_specs=out_specs,
        ),
        compiler_params=pltpu.CompilerParams(
            dimension_semantics=("parallel",),
            vmem_limit_bytes=vmem_limit,
        ),
    )(x2d, w1, b1, w2, b2)

    return out2d[:, :L].reshape(B, S, L)


def reference(features, w_dense, b_dense, w_out, b_out):
    h = jnp.tanh(features @ w_dense + b_dense)
    return h @ w_out + b_out


if __name__ == "__main__":
    # Small shapes consistent with the module: hidden_size=32, num_labels=4, batch=2, seq=8.
    B, S, H, L = 2, 8, 32, 4
    key = jax.random.PRNGKey(0)
    k_x, k_w1, k_b1, k_w2, k_b2 = jax.random.split(key, 5)

    features = jax.random.normal(k_x, (B, S, H), dtype=jnp.float32)
    # PyTorch nn.Linear stores (out, in); we keep the transposed (in, out) layout.
    w_dense = jax.random.normal(k_w1, (H, H), dtype=jnp.float32) * 0.05
    b_dense = jax.random.normal(k_b1, (H,), dtype=jnp.float32) * 0.05
    w_out = jax.random.normal(k_w2, (H, L), dtype=jnp.float32) * 0.05
    b_out = jax.random.normal(k_b2, (L,), dtype=jnp.float32) * 0.05

    ref = reference(features, w_dense, b_dense, w_out, b_out)

    # Default path: bf16 MXU inputs, f32 accumulation / f32 bias+tanh.
    out = model_head(features, w_dense, b_dense, w_out, b_out)
    out = jax.block_until_ready(out)
    assert out.shape == (B, S, L)
    assert jnp.allclose(out, ref, atol=5e-2, rtol=5e-2), "bf16 mismatch vs JAX reference"

    # Full-f32 path: exact match with the reference.
    out_f32 = model_head(features, w_dense, b_dense, w_out, b_out, use_bf16=False)
    out_f32 = jax.block_until_ready(out_f32)
    assert out_f32.shape == (B, S, L)
    assert jnp.allclose(out_f32, ref, atol=1e-5, rtol=1e-5), "f32 mismatch vs JAX reference"

    # Ragged-rows case (M = 21 not a multiple of the tile): exercises the partial
    # last tile handled inside the pipeline (no wrapper-side row padding).
    B2, S2 = 3, 7
    feats2 = jax.random.normal(jax.random.PRNGKey(1), (B2, S2, H), dtype=jnp.float32)
    ref2 = reference(feats2, w_dense, b_dense, w_out, b_out)
    out2 = jax.block_until_ready(model_head(feats2, w_dense, b_dense, w_out, b_out))
    assert out2.shape == (B2, S2, L)
    assert jnp.allclose(out2, ref2, atol=5e-2, rtol=5e-2), "ragged-M mismatch vs JAX reference"

    print("KERNEL_OK")
</pallas_src>

<mosaic_0001>
module attributes {stable_mosaic.version = 11 : i64} {
  func.func @head_kernel(%arg0: i32, %arg1: memref<8x32xf32, #tpu.memory_space<vmem>>, %arg2: memref<32x32xbf16, #tpu.memory_space<vmem>>, %arg3: memref<1x32xf32, #tpu.memory_space<vmem>>, %arg4: memref<32x128xbf16, #tpu.memory_space<vmem>>, %arg5: memref<1x128xf32, #tpu.memory_space<vmem>>, %arg6: memref<8x128xf32, #tpu.memory_space<vmem>>) attributes {dimension_semantics = [#tpu.dimension_semantics<parallel>], iteration_bounds = array<i64: 2>, scalar_prefetch = 0 : i64, scratch_operands = 0 : i64, tpu.core_type = #tpu.core_type<tc>, window_params = [{transform_indices = @transform_0, window_bounds = array<i64: 8, 32>}, {pipeline_mode = #tpu.pipeline_mode<synchronous>, transform_indices = @transform_1, window_bounds = array<i64: 32, 32>}, {pipeline_mode = #tpu.pipeline_mode<synchronous>, transform_indices = @transform_2, window_bounds = array<i64: 1, 32>}, {pipeline_mode = #tpu.pipeline_mode<synchronous>, transform_indices = @transform_3, window_bounds = array<i64: 32, 128>}, {pipeline_mode = #tpu.pipeline_mode<synchronous>, transform_indices = @transform_4, window_bounds = array<i64: 1, 128>}, {transform_indices = @transform_5, window_bounds = array<i64: 8, 128>}]} {
    %c0 = arith.constant 0 : index
    %c0_0 = arith.constant 0 : index
    %0 = vector.load %arg1[%c0, %c0_0] : memref<8x32xf32, #tpu.memory_space<vmem>>, vector<8x32xf32>
    %1 = arith.truncf %0 : vector<8x32xf32> to vector<8x32xbf16>
    %c0_1 = arith.constant 0 : index
    %c0_2 = arith.constant 0 : index
    %2 = vector.load %arg2[%c0_1, %c0_2] : memref<32x32xbf16, #tpu.memory_space<vmem>>, vector<32x32xbf16>
    %cst = arith.constant dense<0.000000e+00> : vector<8x32xf32>
    %3 = tpu.matmul %1, %2, %cst {dimension_numbers = #tpu.dot_dimension_numbers<[1], [0], [0], [1], [0, 0, 1, 1], [], []>} : vector<8x32xbf16>, vector<32x32xbf16>, vector<8x32xf32> -> vector<8x32xf32>
    %c0_3 = arith.constant 0 : index
    %c0_4 = arith.constant 0 : index
    %4 = vector.load %arg3[%c0_3, %c0_4] : memref<1x32xf32, #tpu.memory_space<vmem>>, vector<1x32xf32>
    %5 = vector.broadcast %4 : vector<1x32xf32> to vector<8x32xf32>
    %6 = arith.addf %3, %5 : vector<8x32xf32>
    %7 = math.tanh %6 : vector<8x32xf32>
    %8 = arith.truncf %7 : vector<8x32xf32> to vector<8x32xbf16>
    %c0_5 = arith.constant 0 : index
    %c0_6 = arith.constant 0 : index
    %9 = vector.load %arg4[%c0_5, %c0_6] : memref<32x128xbf16, #tpu.memory_space<vmem>>, vector<32x128xbf16>
    %cst_7 = arith.constant dense<0.000000e+00> : vector<8x128xf32>
    %10 = tpu.matmul %8, %9, %cst_7 {dimension_numbers = #tpu.dot_dimension_numbers<[1], [0], [0], [1], [0, 0, 1, 1], [], []>} : vector<8x32xbf16>, vector<32x128xbf16>, vector<8x128xf32> -> vector<8x128xf32>
    %c0_8 = arith.constant 0 : index
    %c0_9 = arith.constant 0 : index
    %11 = vector.load %arg5[%c0_8, %c0_9] : memref<1x128xf32, #tpu.memory_space<vmem>>, vector<1x128xf32>
    %12 = vector.broadcast %11 : vector<1x128xf32> to vector<8x128xf32>
    %13 = arith.addf %10, %12 : vector<8x128xf32>
    %c0_10 = arith.constant 0 : index
    %c0_11 = arith.constant 0 : index
    %14 = vector.load %arg6[%c0_10, %c0_11] : memref<8x128xf32, #tpu.memory_space<vmem>>, vector<8x128xf32>
    tpu.vector_store %arg6[%c0_10, %c0_11], %13 {strides = array<i32>} : memref<8x128xf32, #tpu.memory_space<vmem>>, vector<8x128xf32>,
    return
  }
  func.func @transform_0(%arg0: i32) -> (i32, i32) {
    %c0_i32 = arith.constant 0 : i32
    %c0_i32_0 = arith.constant 0 : i32
    return %arg0, %c0_i32 : i32, i32
  }
  func.func @transform_1(%arg0: i32) -> (i32, i32) {
    %c0_i32 = arith.constant 0 : i32
    %c0_i32_0 = arith.constant 0 : i32
    %c0_i32_1 = arith.constant 0 : i32
    return %c0_i32, %c0_i32_0 : i32, i32
  }
  func.func @transform_2(%arg0: i32) -> (i32, i32) {
    %c0_i32 = arith.constant 0 : i32
    %c0_i32_0 = arith.constant 0 : i32
    %c0_i32_1 = arith.constant 0 : i32
    return %c0_i32, %c0_i32_0 : i32, i32
  }
  func.func @transform_3(%arg0: i32) -> (i32, i32) {
    %c0_i32 = arith.constant 0 : i32
    %c0_i32_0 = arith.constant 0 : i32
    %c0_i32_1 = arith.constant 0 : i32
    return %c0_i32, %c0_i32_0 : i32, i32
  }
  func.func @transform_4(%arg0: i32) -> (i32, i32) {
    %c0_i32 = arith.constant 0 : i32
    %c0_i32_0 = arith.constant 0 : i32
    %c0_i32_1 = arith.constant 0 : i32
    return %c0_i32, %c0_i32_0 : i32, i32
  }
  func.func @transform_5(%arg0: i32) -> (i32, i32) {
    %c0_i32 = arith.constant 0 : i32
    %c0_i32_0 = arith.constant 0 : i32
    return %arg0, %c0_i32 : i32, i32
  }
}

</mosaic_0001>

<bundles_post_ra>
// kernel: tpu_custom_call.1
= control target key start
LH: loop header
LB: loop body
LE: loop exit
PB: predicated region body
PF: predicated region fallthrough
CT: control target
= control target key end

     0   :  { %10 = vsyncpa [#allocation3], 0  ;;  %s1071_s0 = inlined_call_operand.hbm [shape: f32[16,32], index: 0, kind: input, shape index: {}]   ;;  %s1072_s1 = inlined_call_operand.hbm [shape: bf16[32,32], index: 1, kind: input, shape index: {}]   ;;  %s1073_s2 = inlined_call_operand.vmem [shape: f32[1,32], index: 2, kind: input, shape index: {}]   ;;  %s1074_s3 = inlined_call_operand.hbm [shape: bf16[32,128], index: 3, kind: input, shape index: {}]   ;;  %s1075_s4 = inlined_call_operand.vmem [shape: f32[1,128], index: 4, kind: input, shape index: {}]   ;;  %s1076_s5 = inlined_call_operand.hbm [shape: f32[16,128], index: 5, kind: output, shape index: {}]  }
   0x1   :  { %12 = vsyncpa [#allocation3 + $0x1], 0 }
   0x2   :  { %13 = vsyncpa [#allocation6], 0 }
   0x3   :  { %14 = vsyncpa [#allocation4], 0 }
   0x4   :  { %16 = vsyncpa [#allocation4 + $0x1], 0  ;;  %s830_s18 = smov 0   ;;  %s832_s19 = smov 0  }
   0x5   :  { %s834_s20 = smov 0   ;;  %s836_s21 = smov 0  }
   0x6 LB: > { %s851_s22 = sadd.s32 4294967295, %s790_s21   ;;  %s511_s23 = sadd.s32 4294967294, %s790_s21   ;;  %s790_s21 = sphi %s836_s21, %s1096_s21   ;;  %s786_s20 = sphi %s834_s20, %s1095_s20   ;;  %s782_s19 = sphi %s832_s19, %s1094_s19   ;;  %s778_s18 = sphi %s830_s18, %s1093_s18  }
   0x7   : > { %p42_p0 = scmp.ne.s32.totalorder %s782_s19, %s778_s18  ;;  %p1077_p1 = scmp.eq.s32.totalorder %s851_s22, 0 }
   0x8   : > { %p156_p3 = scmp.eq.s32.totalorder %s511_s23, 1  ;;  %p512_p5 = scmp.ge.s32.totalorder %s790_s21, 1 }
   0x9   : > { %p860_p4 = por %p1077_p1, %p42_p0  ;;  %p163_p7 = scmp.lt.s32.totalorder %s790_s21, 3 }
   0xa   : > { %p865_p6 = por %p156_p3, %p42_p0  ;;  %s792_s27 = smov [#allocation5]  }
   0xb   : > { %s1080_s24 = scalar_select %p860_p4, 1, 0 }
   0xc   : > { %s1081_s25 = scalar_select %p865_p6, 1, 0 }
   0xd   : > { %p870_p8 = pnand %p512_p5, %p163_p7  ;;  %s175_s28 = sshll.u32 %s792_s27, 4  ;;  %s874_s28 = int_to_ptr.vmem [resolvable:$true] %s175_s28 }
   0xe   : > { %s793_s30 = smov [#allocation7]   ;;  %s634_s9 = scalar_lea.hbm %s1072_s1, 256 }
   0xf   : > { %p569_p9 = pneg %p870_p8  ;;  %s191_s6 = sshll.u32 %s793_s30, 4  ;;  %s885_s6 = int_to_ptr.vmem [resolvable:$true] %s191_s6 }
  0x10   : > { %p635_p12 = scmp.ne.s32.totalorder %s1072_s1, %s634_s9  ;;  %p641_p5 = scmp.lt.u32.totalorder %s634_s9, %s1072_s1 }
  0x11   : > { %p881_p11 = pnand %p569_p9, %p1077_p1 }
  0x13   : > { %p636_p13 = pneg %p881_p11 }
  0x15   : > { %p637_p0 = pnand %p636_p13, %p635_p12 }
  0x17   : > { %p638_p3 = pneg %p637_p0 }
  0x19   : > { %p643_p7 = pnand %p641_p5, %p638_p3 }
  0x1b   : > { %646 = shalt.err (!%p643_p7)
}
  0x1c   : > { %s647_s14 = scalar_lea.vmem %s874_s28, 256  ;;  %p655_p2 = scmp.lt.s32.totalorder %s874_s28, %s874_s28 }
  0x1d   : > { %p648_p9 = scmp.ne.s32.totalorder %s874_s28, %s647_s14  ;;  %p656_p12 = scmp.lt.s32.totalorder %s647_s14, %s647_s14 }
  0x1f   : > { %p650_p10 = pnand %p648_p9, %p636_p13  ;;  %p657_p0 = por %p656_p12, %p655_p2 }
  0x21   : > { %p651_p1 = pneg %p650_p10 }
  0x23   : > { %p658_p6 = pnand %p657_p0, %p651_p1 }
  0x25   : > { %661 = shalt.err (!%p658_p6)
}
  0x26   : > { %s794_s15 = smov 64   ;;  %s795_s16 = smov 4  }
  0x27   : > { %572 = dma.hbm_to_vmem [thread:$0]  (!%p881_p11), %s1072_s1, 256, %s874_s28, [#allocation6], %s794_s15, %s794_s15, %s795_s16  }
  0x28   : > { %s662_s7 = scalar_lea.hbm %s1074_s3, 256 }
  0x29   : > { %p663_p2 = scmp.ne.s32.totalorder %s1074_s3, %s662_s7  ;;  %p669_p10 = scmp.lt.u32.totalorder %s662_s7, %s1074_s3 }
  0x2b   : > { %p665_p1 = pnand %p663_p2, %p636_p13 }
  0x2d   : > { %p666_p6 = pneg %p665_p1 }
  0x2f   : > { %p671_p3 = pnand %p669_p10, %p666_p6 }
  0x31   : > { %674 = shalt.err (!%p671_p3)
}
  0x32   : > { %s675_s28 = scalar_lea.vmem %s885_s6, 256  ;;  %p683_p12 = scmp.lt.s32.totalorder %s885_s6, %s885_s6 }
  0x33   : > { %p676_p5 = scmp.ne.s32.totalorder %s885_s6, %s675_s28  ;;  %p684_p0 = scmp.lt.s32.totalorder %s675_s28, %s675_s28 }
  0x35   : > { %p678_p7 = pnand %p676_p5, %p636_p13  ;;  %p685_p2 = por %p684_p0, %p683_p12 }
  0x37   : > { %p679_p9 = pneg %p678_p7 }
  0x39   : > { %p686_p1 = pnand %p685_p2, %p679_p9 }
  0x3b   : > { %689 = shalt.err (!%p686_p1)
}
  0x3c   : > { %575 = dma.hbm_to_vmem [thread:$0]  (!%p881_p11), %s1074_s3, 256, %s885_s6, [#allocation6], %s794_s15, %s794_s15, %s795_s16  }
  0x3d   : > { %s940_s14 = sadd.s32 1, %s790_s21   ;;  %s29_s29 = sadd.s32 1, %s786_s20 }
  0x3e   : > { %s26_s17 = ssub.s32 %s790_s21, %s940_s14  ;;  %p36_p13 = scmp.ne.s32.totalorder %s786_s20, %s782_s19 }
  0x3f   : > { %p27_p6 = scmp.eq.s32.totalorder %s26_s17, 0  ;;  %p37_p10 = scmp.eq.s32.totalorder %s790_s21, 0 }
  0x40   : > { %p1084_p3 = scmp.eq.s32.totalorder %s851_s22, 1  ;;  %p586_p7 = scmp.lt.s32.totalorder %s790_s21, 2 }
  0x41   : > { %s956_s27 = scalar_select %p27_p6, %s786_s20, %s29_s29  }
  0x42   : > { %p950_p5 = por %p1084_p3, %p36_p13  ;;  %p38_p9 = por %p37_p10, %p36_p13 }
  0x43   : > { %s208_s30 = sand.u32 1, %s786_s20   ;;  %s517_s6 = sshll.u32 %s790_s21, 7 }
  0x44   : > { %s1085_s23 = scalar_select %p950_p5, 1, 0 }
  0x45   : > { %s516_s7 = sshll.u32 %s208_s30, 3  ;;  %s963_s8 = scalar_lea.hbm %s1071_s0, %s517_s6 }
  0x46   : > { %s212_s9 = scalar_lea.vmem [#allocation2], %s516_s7  ;;  %p967_p11 = pnand %p586_p7, %p38_p9 }
  0x47   : > { %s219_s10 = sshll.u32 %s212_s9, 4  ;;  %s209_s28 = scalar_lea.sflag [#allocation3], %s208_s30  ;;  %s965_s10 = int_to_ptr.vmem [resolvable:$true] %s219_s10 }
  0x48   : > { %s690_s12 = scalar_lea.hbm %s963_s8, 128  ;;  %p692_p0 = pneg %p967_p11 }
  0x49   : > { %p691_p12 = scmp.ne.s32.totalorder %s963_s8, %s690_s12  ;;  %s695_s17 = scalar_lea.hbm %s1071_s0, 256 }
  0x4a   : > { %p696_p13 = scmp.lt.u32.totalorder %s963_s8, %s1071_s0  ;;  %p697_p6 = scmp.lt.u32.totalorder %s695_s17, %s690_s12 }
  0x4b   : > { %p693_p2 = pnand %p692_p0, %p691_p12  ;;  %p699_p3 = scmp.lt.u32.totalorder %s690_s12, %s963_s8 }
  0x4c   : > { %p698_p10 = por %p697_p6, %p696_p13 }
  0x4d   : > { %p694_p1 = pneg %p693_p2 }
  0x4e   : > { %p700_p7 = por %p699_p3, %p698_p10 }
  0x50   : > { %p701_p9 = pnand %p700_p7, %p694_p1 }
  0x52   : > { %704 = shalt.err (!%p701_p9)
}
  0x53   : > { %s705_s30 = scalar_lea.vmem %s965_s10, 128  ;;  %s796_s15 = smov [#allocation2]  }
  0x54   : > { %p706_p12 = scmp.ne.s32.totalorder %s965_s10, %s705_s30  ;;  %s710_s16 = sshll.u32 %s796_s15, 4  ;;  %s711_s16 = int_to_ptr.vmem [resolvable:$false] %s710_s16 }
  0x55   : > { %s712_s9 = scalar_lea.vmem %s711_s16, 256  ;;  %p713_p4 = scmp.lt.s32.totalorder %s965_s10, %s711_s16 }
  0x56   : > { %p708_p2 = pnand %p706_p12, %p692_p0  ;;  %p714_p13 = scmp.lt.s32.totalorder %s712_s9, %s705_s30 }
  0x58   : > { %p709_p5 = pneg %p708_p2  ;;  %p715_p6 = por %p714_p13, %p713_p4 }
  0x5a   : > { %p716_p10 = pnand %p715_p6, %p709_p5 }
  0x5c   : > { %719 = shalt.err (!%p716_p10)
}
  0x5d   : > { %579 = dma.hbm_to_vmem [thread:$0]  (!%p967_p11), %s963_s8, 128, %s965_s10, %s209_s28  }
  0x5e   : > { %228 = sbr.rel (%p870_p8) target bundleno = 570 (0x23a), region = 40  ;;  %s999_s12 = sand.u32 (!%p870_p8), 1, %s782_s19  }
  0x5f   : > { %s519_s13 = sshll.u32 (!%p870_p8), %s999_s12, 3  ;;  %s231_s29 = scalar_lea.sflag (!%p870_p8), [#allocation3], %s999_s12 }
  0x60   : > { %s234_s17 = scalar_lea.vmem (!%p870_p8), [#allocation2], %s519_s13  ;;  %p1087_p4 = scmp.ne.s32.totalorder (!%p870_p8), %s1080_s24, 0 }
  0x65   : > { %765 = dma.done.wait (%p1087_p4), %s231_s29, 128  }
  0x66   : > { %767 = vsyncadd (%p1087_p4), %s231_s29, 4294967168  ;;  %p1088_p5 = scmp.eq.s32.totalorder %s851_s22, 0 }
  0x68   : > { %769 = dma.done.wait (%p1088_p5), [#allocation6], 512   ;;  %p1089_p8 = pmov %p1088_p5 }
  0x69   : > { %v797_v0 = vmov 0.0   ;;  %vm798_vm0 = vmmov 0   ;;  %v628_v1 = vld [vmem:[#allocation5] sm:$0xff]   ;;  %v629_v2 = vld [vmem:[#allocation5 + $0x8] sm:$0xff]   ;;  %v270_v3 = vld [vmem:[%s234_s17] sm:$0xff]  ;;  %vm295_vm1 = vcmask 261120  }
  0x6a   : > { %771 = vsyncadd (%p1089_p8), [#allocation6], 4294966784  ;;  %541 = vmatprep.subr.bf16.mxu0 %v797_v0  ;;  %545 = vmatprep.mubr.msk.bf16.mxu0 %vm798_vm0, %v797_v0  ;;  %v271_v4 = vpack.c.bf16 %v270_v3, %v270_v3  ;;  %v630_v5 = vld [vmem:[#allocation7] sm:$0xff]   ;;  %v631_v6 = vld [vmem:[#allocation7 + $0x8] sm:$0xff]   ;;  %s532_s11 = sshll.u32 %s851_s22, 7  ;;  %s268_s28 = scalar_lea.vmem [#allocation8], %s519_s13 }
  0x6b   : > { %549 = vmatprep.subr.bf16.mxu1 %v797_v0  ;;  %553 = vmatprep.mubr.msk.bf16.mxu1 %vm798_vm0, %v797_v0  ;;  %v523_v7 = vld [vmem:[%s1073_s2] ss:$0 sm:$0xff]  ;;  %s422_s7 = sshll.u32 %s268_s28, 4  ;;  %s1027_s15 = scalar_lea.hbm %s1076_s5, %s532_s11  ;;  %s1029_s7 = int_to_ptr.vmem [resolvable:$true] %s422_s7 }
  0x6c   : > { %542 = vmatpush3.bf16.msra.mxu0 %v628_v1  ;;  %550 = vmatpush3.bf16.msra.mxu1 %v630_v5  ;;  %v527_v15 = vld [vmem:[%s1075_s4] ss:$0 sm:$0xff]  ;;  %s409_s22 = scalar_lea.sflag [#allocation4], %s999_s12  ;;  %s720_s16 = scalar_lea.vmem %s1029_s7, 128 }
  0x6d   : > { %543 = vmatprep.subr.bf16.mxu0 %v797_v0  ;;  %551 = vmatprep.subr.bf16.mxu1 %v797_v0  ;;  %p721_p11 = scmp.ne.s32.totalorder %s1029_s7, %s720_s16  ;;  %p1090_p0 = scmp.ne.s32.totalorder %s1085_s23, 0 }
  0x6e   : > { %s799_s9 = smov [#allocation8]  }
  0x6f   : > { %p722_p1 = pnand %p721_p11, %p1090_p0  ;;  %s724_s13 = sshll.u32 %s799_s9, 4  ;;  %s725_s13 = int_to_ptr.vmem [resolvable:$false] %s724_s13 }
  0x70   : > { %544 = vmatpush3.bf16.msra.mxu0 %v629_v2  ;;  %552 = vmatpush3.bf16.msra.mxu1 %v631_v6  ;;  %s726_s29 = scalar_lea.vmem %s725_s13, 256  ;;  %p727_p7 = scmp.lt.s32.totalorder %s1029_s7, %s725_s13 }
  0x71   : > { %p723_p3 = pneg %p722_p1  ;;  %p728_p9 = scmp.lt.s32.totalorder %s726_s29, %s720_s16 }
  0x73   : > { %546 = vmatmul.mubr.msk.bf16.vlgmr.msra.gmra.mrb[0].mxu0 %vm295_vm1, %v271_v4  ;;  %p729_p12 = por %p728_p9, %p727_p7 }
  0x75   : > { %p730_p2 = pnand %p729_p12, %p723_p3 }
 0x146   : > { %v333_v8 = vpop.f32.mrb[0].mxu0 }
 0x147   : > { %v334_v9 = vadd.f32 %v523_v7, %v333_v8  ;;  %v547_v10 = vpop.f32.mrb[1].mxu0 }
 0x148   : > { %v336_v11 = vpop.f32.mrb[2].mxu0 }
 0x149   : > { %632 = vtanh.f32 %v334_v9  ;;  %v548_v12 = vpop.f32.mrb[3].mxu0 }
 0x153   : > { %v633_v13 = vpop.eup %632 }
 0x154   : > { %v340_v14 = vpack.c.bf16 %v633_v13, %v633_v13 }
 0x156   : > { %554 = vmatmul.mubr.msk.bf16.vlgmr.msra.gmra.mrb[0].mxu1 %vm295_vm1, %v340_v14 }
 0x229   : > { %v401_v16 = vpop.f32.mrb[0].mxu1 }
 0x22a   : > { %v402_v17 = vadd.f32 %v527_v15, %v401_v16  ;;  %v555_v18 = vpop.f32.mrb[1].mxu1 }
 0x22b   : > { %v404_v19 = vpop.f32.mrb[2].mxu1 }
 0x22c   : > { %407 = vst [vmem:[%s268_s28] sm:$0xff] %v402_v17  ;;  %v556_v20 = vpop.f32.mrb[3].mxu1 }
 0x22d   : > { %733 = shalt.err (!%p730_p2)
}
 0x22e   : > { %s734_s12 = scalar_lea.hbm %s1027_s15, 128  ;;  %s738_s26 = scalar_lea.hbm %s1076_s5, 256 }
 0x22f   : > { %p735_p13 = scmp.ne.s32.totalorder %s1027_s15, %s734_s12  ;;  %p739_p4 = scmp.lt.u32.totalorder %s1027_s15, %s1076_s5 }
 0x230   : > { %p740_p5 = scmp.lt.u32.totalorder %s738_s26, %s734_s12  ;;  %p742_p11 = scmp.lt.u32.totalorder %s734_s12, %s1027_s15 }
 0x231   : > { %p736_p6 = pnand %p735_p13, %p1090_p0 }
 0x232   : > { %p741_p8 = por %p740_p5, %p739_p4 }
 0x233   : > { %p737_p10 = pneg %p736_p6 }
 0x234   : > { %p743_p1 = por %p742_p11, %p741_p8 }
 0x236   : > { %p744_p3 = pnand %p743_p1, %p737_p10 }
 0x238   : > { %747 = shalt.err (!%p744_p3)
}
 0x239   : > { %567 = dma.vmem_to_hbm [thread:$0]  (%p1090_p0), %s1029_s7, 128, %s1027_s15, %s409_s22  }
 0x23a PF: > { %s434_s11 = sand.u32 1, %s778_s18   ;;  %p1091_p7 = scmp.ne.s32.totalorder %s1081_s25, 0 }
 0x23b   : > { %p1092_p9 = scmp.ge.s32.totalorder %s790_s21, 2  ;;  %s435_s28 = scalar_lea.sflag [#allocation4], %s434_s11 }
 0x23d   : > { %p581_p12 = pnand %p1092_p9, %p1091_p7 }
 0x23f   : > { %773 = dma.done.wait (!%p581_p12), %s435_s28, 128  }
 0x240   : > { %775 = vsyncadd (!%p581_p12), %s435_s28, 4294967168  ;;  %p19_p2 = scmp.ge.s32.totalorder %s940_s14, 4   ;;  %s1093_s18 = smov %s782_s19 }
 0x241   : > { %s1094_s19 = smov %s786_s20  ;;  %s1095_s20 = smov %s956_s27 }
 0x242   : > { %s1096_s21 = smov %s940_s14  ;;  %21 = sbr.rel (!%p19_p2) target bundleno = 6 (0x6), region = 93 }
 0x249   :  { %440 = vsyncpa [#allocation3], 1 }
 0x24a   :  { %442 = vsyncpa [#allocation3 + $0x1], 1 }
 0x24b   :  { %443 = vsyncpa [#allocation6], 1 }
 0x24c   :  { %444 = vsyncpa [#allocation4], 1 }
 0x24d   :  { %446 = vsyncpa [#allocation4 + $0x1], 1 }

</bundles_post_ra>
